<compile_context>
chip_gen: v5e
topology: v5e:2x2
jax: 0.10.0
libtpu: 0.0.40
codegen_flags: <defaults>
</compile_context>

<pallas_src>
import functools
import math

import jax
import jax.numpy as jnp
from jax.experimental import pallas as pl
from jax.experimental.pallas import tpu as pltpu


# ----------------------------------------------------------------------------
# small helpers
# ----------------------------------------------------------------------------
def _round_up(x, m):
    return -(-x // m) * m


def _pad2(x, rows, cols):
    r, c = x.shape
    if r == rows and c == cols:
        return x
    return jnp.pad(x, ((0, rows - r), (0, cols - c)))


# ----------------------------------------------------------------------------
# Kernel 1: tiled fused matmul
#   out = relu?((A @ B [+ add]) [* scale + shift])
#   A:(M,K) bf16   B:(K,N) bf16   add:(M,N) f32   scale/shift:(1,N) f32
# Grid (M/tm, N/tn, K/tk), f32 VMEM accumulator, epilogue on last K step.
# ----------------------------------------------------------------------------
def _fused_mm_kernel(*refs, has_add, has_affine, apply_relu):
    a_ref, b_ref = refs[0], refs[1]
    pos = 2
    add_ref = None
    if has_add:
        add_ref = refs[pos]
        pos += 1
    scale_ref = shift_ref = None
    if has_affine:
        scale_ref, shift_ref = refs[pos], refs[pos + 1]
        pos += 2
    o_ref = refs[pos]
    acc_ref = refs[pos + 1]

    k = pl.program_id(2)

    @pl.when(k == 0)
    def _init():
        acc_ref[...] = jnp.zeros_like(acc_ref)

    acc_ref[...] += jnp.dot(a_ref[...], b_ref[...],
                            preferred_element_type=jnp.float32)

    @pl.when(k == pl.num_programs(2) - 1)
    def _finalize():
        out = acc_ref[...]
        if has_add:
            out = out + add_ref[...]
        if has_affine:
            out = out * scale_ref[...] + shift_ref[...]
        if apply_relu:
            out = jnp.maximum(out, 0.0)
        o_ref[...] = out.astype(o_ref.dtype)


_TM, _TN, _TK = 256, 256, 256   # block targets; footprint well under 64 MiB (v7x)


def fused_matmul(a, b, *, add=None, scale=None, shift=None, relu=False):
    """out = relu?((a @ b [+ add]) [* scale + shift]) in one tiled Pallas call."""
    M, K = a.shape
    K2, N = b.shape
    assert K == K2, (a.shape, b.shape)

    Mp = _round_up(M, 8)
    tm = min(_TM, Mp)
    Mp = _round_up(Mp, tm)
    Kp = _round_up(K, 128)
    tk = min(_TK, Kp)
    Kp = _round_up(Kp, tk)
    Np = _round_up(N, 128)
    tn = min(_TN, Np)
    Np = _round_up(Np, tn)

    # bf16 MXU inputs, f32 accumulation / epilogue (v5e epilogue stays f32).
    a_p = _pad2(a.astype(jnp.float32), Mp, Kp).astype(jnp.bfloat16)
    b_p = _pad2(b.astype(jnp.float32), Kp, Np).astype(jnp.bfloat16)

    args = [a_p, b_p]
    in_specs = [
        pl.BlockSpec((tm, tk), lambda i, j, k: (i, k)),
        pl.BlockSpec((tk, tn), lambda i, j, k: (k, j)),
    ]

    has_add = add is not None
    if has_add:
        args.append(_pad2(add.astype(jnp.float32), Mp, Np))
        in_specs.append(pl.BlockSpec((tm, tn), lambda i, j, k: (i, j)))

    has_affine = (scale is not None) or (shift is not None)
    if has_affine:
        sc = (jnp.ones((N,), jnp.float32) if scale is None
              else scale.astype(jnp.float32).reshape(-1))
        sh = (jnp.zeros((N,), jnp.float32) if shift is None
              else shift.astype(jnp.float32).reshape(-1))
        args.append(_pad2(sc.reshape(1, N), 1, Np))
        args.append(_pad2(sh.reshape(1, N), 1, Np))
        in_specs.append(pl.BlockSpec((1, tn), lambda i, j, k: (0, j)))
        in_specs.append(pl.BlockSpec((1, tn), lambda i, j, k: (0, j)))

    kernel = functools.partial(_fused_mm_kernel, has_add=has_add,
                               has_affine=has_affine, apply_relu=relu)
    out = pl.pallas_call(
        kernel,
        out_shape=jax.ShapeDtypeStruct((Mp, Np), jnp.float32),
        grid=(Mp // tm, Np // tn, Kp // tk),
        in_specs=in_specs,
        out_specs=pl.BlockSpec((tm, tn), lambda i, j, k: (i, j)),
        scratch_shapes=[pltpu.VMEM((tm, tn), jnp.float32)],
        compiler_params=pltpu.CompilerParams(
            dimension_semantics=("parallel", "parallel", "arbitrary")),
    )(*args)
    return out[:M, :N]


# ----------------------------------------------------------------------------
# Kernel 2: fused edge-message + scatter-add (index driven, O(E*C))
#   agg[dst[e]] += x[src[e]] @ Wnbr + e_out[e] @ Wem
# src/dst are scalar-prefetched into SMEM; output block is VMEM-resident.
# ----------------------------------------------------------------------------
def _edge_msg_scatter_kernel(src_ref, dst_ref,                 # SMEM prefetch
                             h_ref, e_ref, wn_ref, we_ref,     # inputs
                             agg_ref,                          # output (resident)
                             xg_ref, msg_ref,                  # VMEM scratch
                             *, te):
    eb = pl.program_id(0)

    @pl.when(eb == 0)
    def _init():
        agg_ref[...] = jnp.zeros_like(agg_ref)

    base = eb * te

    def gather_body(r, carry):
        s = src_ref[base + r]
        xg_ref[pl.ds(r, 1), :] = h_ref[pl.ds(s, 1), :]
        return carry

    jax.lax.fori_loop(0, te, gather_body, 0)

    # both message matmuls fused in one kernel; f32 accumulation throughout
    msg_ref[...] = (
        jnp.dot(xg_ref[...], wn_ref[...], preferred_element_type=jnp.float32)
        + jnp.dot(e_ref[...], we_ref[...], preferred_element_type=jnp.float32))

    def scatter_body(r, carry):
        d = dst_ref[base + r]
        agg_ref[pl.ds(d, 1), :] = agg_ref[pl.ds(d, 1), :] + msg_ref[pl.ds(r, 1), :]
        return carry

    jax.lax.fori_loop(0, te, scatter_body, 0)


def edge_message_scatter(h, e, w_nbr, w_em, src, dst, n_nodes, *, te_max=256):
    N, Cin = h.shape
    E, Ce = e.shape
    Cin2, Cout = w_nbr.shape
    Ce2, Cout2 = w_em.shape
    assert Cin == Cin2 and Ce == Ce2 and Cout == Cout2

    Cin_p = _round_up(Cin, 128)
    Ce_p = _round_up(Ce, 128)
    Cout_p = _round_up(Cout, 128)
    Nh_p = _round_up(N, 8)
    Nagg_p = _round_up(N + 1, 8)          # >= 1 spare row for padded edges
    te = min(te_max, _round_up(E, 8))
    Ep = _round_up(E, te)

    h_p = _pad2(h.astype(jnp.float32), Nh_p, Cin_p)
    e_p = _pad2(e.astype(jnp.float32), Ep, Ce_p)
    wn_p = _pad2(w_nbr.astype(jnp.float32), Cin_p, Cout_p)
    we_p = _pad2(w_em.astype(jnp.float32), Ce_p, Cout_p)
    src_p = jnp.pad(src.astype(jnp.int32), (0, Ep - E), constant_values=0)
    dst_p = jnp.pad(dst.astype(jnp.int32), (0, Ep - E),
                    constant_values=n_nodes)        # padded edges -> spare row

    kernel = functools.partial(_edge_msg_scatter_kernel, te=te)
    agg = pl.pallas_call(
        kernel,
        out_shape=jax.ShapeDtypeStruct((Nagg_p, Cout_p), jnp.float32),
        grid_spec=pltpu.PrefetchScalarGridSpec(
            num_scalar_prefetch=2,
            grid=(Ep // te,),
            in_specs=[
                pl.BlockSpec((Nh_p, Cin_p), lambda eb, s, d: (0, 0)),
                pl.BlockSpec((te, Ce_p), lambda eb, s, d: (eb, 0)),
                pl.BlockSpec((Cin_p, Cout_p), lambda eb, s, d: (0, 0)),
                pl.BlockSpec((Ce_p, Cout_p), lambda eb, s, d: (0, 0)),
            ],
            out_specs=pl.BlockSpec((Nagg_p, Cout_p), lambda eb, s, d: (0, 0)),
            scratch_shapes=[
                pltpu.VMEM((te, Cin_p), jnp.float32),
                pltpu.VMEM((te, Cout_p), jnp.float32),
            ],
        ),
        compiler_params=pltpu.CompilerParams(
            dimension_semantics=("arbitrary",)),
    )(src_p, dst_p, h_p, e_p, wn_p, we_p)
    return agg[:N, :Cout]


# ----------------------------------------------------------------------------
# Kernel 3: fused global_add_pool + BatchNorm(eval) + ReLU (segment-sum)
#   out[g] = relu( (sum_{batch[i]==g} h[i]) * scale + shift )
# ----------------------------------------------------------------------------
def _pool_bn_relu_kernel(batch_ref,                  # SMEM prefetch
                         h_ref, scale_ref, shift_ref,
                         out_ref, *, tr):
    nb = pl.program_id(0)

    @pl.when(nb == 0)
    def _init():
        out_ref[...] = jnp.zeros_like(out_ref)

    base = nb * tr

    def body(r, carry):
        g = batch_ref[base + r]
        out_ref[pl.ds(g, 1), :] = out_ref[pl.ds(g, 1), :] + h_ref[pl.ds(r, 1), :]
        return carry

    jax.lax.fori_loop(0, tr, body, 0)

    @pl.when(nb == pl.num_programs(0) - 1)
    def _finalize():
        out_ref[...] = jnp.maximum(
            out_ref[...] * scale_ref[...] + shift_ref[...], 0.0)


def global_pool_bn_relu(h, batch, num_graphs, scale, shift, *, tr_max=256):
    N, C = h.shape
    Cp = _round_up(C, 128)
    Bp = _round_up(num_graphs + 1, 8)     # >= 1 spare row for padded nodes
    tr = min(tr_max, _round_up(N, 8))
    Np = _round_up(N, tr)

    h_p = _pad2(h.astype(jnp.float32), Np, Cp)
    batch_p = jnp.pad(batch.astype(jnp.int32), (0, Np - N),
                      constant_values=num_graphs)
    sc = _pad2(scale.astype(jnp.float32).reshape(1, C), 1, Cp)
    sh = _pad2(shift.astype(jnp.float32).reshape(1, C), 1, Cp)

    kernel = functools.partial(_pool_bn_relu_kernel, tr=tr)
    out = pl.pallas_call(
        kernel,
        out_shape=jax.ShapeDtypeStruct((Bp, Cp), jnp.float32),
        grid_spec=pltpu.PrefetchScalarGridSpec(
            num_scalar_prefetch=1,
            grid=(Np // tr,),
            in_specs=[
                pl.BlockSpec((tr, Cp), lambda nb, b: (nb, 0)),
                pl.BlockSpec((1, Cp), lambda nb, b: (0, 0)),
                pl.BlockSpec((1, Cp), lambda nb, b: (0, 0)),
            ],
            out_specs=pl.BlockSpec((Bp, Cp), lambda nb, b: (0, 0)),
        ),
        compiler_params=pltpu.CompilerParams(
            dimension_semantics=("arbitrary",)),
    )(batch_p, h_p, sc, sh)
    return out[:num_graphs, :C]


# ----------------------------------------------------------------------------
# Parameter construction (deterministic, synthetic).
# ----------------------------------------------------------------------------
_BN_EPS = 1e-5


def _linear_init(key, fan_in, fan_out):
    kw, kb = jax.random.split(key)
    bound = 1.0 / math.sqrt(fan_in)
    w = jax.random.uniform(kw, (fan_in, fan_out), jnp.float32, -bound, bound)
    b = jax.random.uniform(kb, (fan_out,), jnp.float32, -bound, bound)
    return w, b


def _bn_init(c):
    # freshly reset BatchNorm1d: gamma=1, beta=0, running_mean=0, running_var=1
    gamma = jnp.ones((c,), jnp.float32)
    beta = jnp.zeros((c,), jnp.float32)
    scale = gamma / jnp.sqrt(1.0 + _BN_EPS)   # eval mode with running stats
    shift = beta
    return scale, shift


def init_params(key, in_x, hid_x, out_x, in_e, hid_e, num_classes, num_layers):
    params = {}
    keys = jax.random.split(key, 4 + 8 * num_layers)
    ki = iter(keys)

    # lin_start + bn_start
    params["lin_start"] = _linear_init(next(ki), in_x, hid_x)
    params["bn_start"] = _bn_init(hid_x)

    # conv layers (concrete instantiation of the abstract init_conv)
    convs = []
    cx_in, ce_in = hid_x, in_e
    for layer in range(num_layers):
        cx_out = out_x if layer == num_layers - 1 else hid_x
        ce_out = hid_e
        We, be = _linear_init(next(ki), ce_in, ce_out)
        Wem, _ = _linear_init(next(ki), ce_out, cx_out)
        Wnbr, _ = _linear_init(next(ki), cx_in, cx_out)
        Wself, bx = _linear_init(next(ki), cx_in, cx_out)
        convs.append(dict(We=We, be=be, Wem=Wem, Wnbr=Wnbr, Wself=Wself, bx=bx))
        cx_in, ce_in = cx_out, ce_out
    params["convs"] = convs

    # bns_embd ARE applied to pooled embeddings (self.bns are unused in forward)
    params["bns_embd"] = [
        _bn_init(out_x if layer == num_layers - 1 else hid_x)
        for layer in range(num_layers)
    ]

    # final classifier
    lin_in = hid_x * (num_layers - 1) + out_x
    params["lin"] = _linear_init(next(ki), lin_in, num_classes)
    return params


# ----------------------------------------------------------------------------
# Forward pass (inference mode).
# ----------------------------------------------------------------------------
def gnn_pred_e_forward(params, x, edge_index, edge_attr, batch, num_graphs):
    N = x.shape[0]
    src = edge_index[0].astype(jnp.int32)
    dst = edge_index[1].astype(jnp.int32)

    # lin_start -> BatchNorm1d(eval) -> ReLU (bias + BN folded into epilogue)
    Ws, bs = params["lin_start"]
    bn_s, bn_h = params["bn_start"]
    h = fused_matmul(x, Ws, scale=bn_s, shift=bn_s * bs + bn_h, relu=True)

    e = edge_attr
    embds = []
    for layer, cp in enumerate(params["convs"]):
        # edge update: e_out = relu(e @ We + be)
        e_out = fused_matmul(e, cp["We"], shift=cp["be"], relu=True)
        # fused gather + message matmuls + scatter-add (index driven)
        agg = edge_message_scatter(h, e_out, cp["Wnbr"], cp["Wem"], src, dst, N)
        # node update: h = h @ Wself + agg + bx (fused epilogue)
        h = fused_matmul(h, cp["Wself"], add=agg, shift=cp["bx"])
        e = e_out

        # global_add_pool -> BatchNorm1d(eval) -> ReLU (dropout: eval = id)
        bn_s, bn_h = params["bns_embd"][layer]
        embd = global_pool_bn_relu(h, batch, num_graphs, bn_s, bn_h)
        embds.append(embd)

    embds = jnp.concatenate(embds, axis=-1)
    Wl, bl = params["lin"]
    out = fused_matmul(embds, Wl, shift=bl)
    return out


# ----------------------------------------------------------------------------
# Demo
# ----------------------------------------------------------------------------
if __name__ == "__main__":
    key = jax.random.PRNGKey(0)
    k_x, k_e, k_src, k_dst, k_params = jax.random.split(key, 5)

    # Small synthetic graph batch: 2 graphs, 8 nodes each, 32 edges.
    N_NODES, N_EDGES, N_GRAPHS = 16, 32, 2
    IN_X, HID_X, OUT_X = 4, 32, 16
    IN_E, HID_E, OUT_E = 6, 16, 16
    NUM_CLASSES, NUM_LAYERS = 3, 3

    x = jax.random.normal(k_x, (N_NODES, IN_X), jnp.float32)
    edge_attr = jax.random.normal(k_e, (N_EDGES, IN_E), jnp.float32)
    # keep edges within each graph (first 16 edges in graph 0, rest in graph 1)
    src0 = jax.random.randint(k_src, (N_EDGES // 2,), 0, 8)
    dst0 = jax.random.randint(k_dst, (N_EDGES // 2,), 0, 8)
    src1 = jax.random.randint(jax.random.fold_in(k_src, 1), (N_EDGES // 2,), 8, 16)
    dst1 = jax.random.randint(jax.random.fold_in(k_dst, 1), (N_EDGES // 2,), 8, 16)
    edge_index = jnp.stack([jnp.concatenate([src0, src1]),
                            jnp.concatenate([dst0, dst1])], axis=0)
    batch = jnp.concatenate([jnp.zeros((8,), jnp.int32),
                             jnp.ones((8,), jnp.int32)])

    params = init_params(k_params, IN_X, HID_X, OUT_X, IN_E, HID_E,
                         NUM_CLASSES, NUM_LAYERS)

    fwd = jax.jit(gnn_pred_e_forward, static_argnames=("num_graphs",))
    out = fwd(params, x, edge_index, edge_attr, batch, num_graphs=N_GRAPHS)
    out = jax.block_until_ready(out)
    assert out.shape == (N_GRAPHS, NUM_CLASSES), out.shape
    assert bool(jnp.all(jnp.isfinite(out)))
    print("KERNEL_OK")
</pallas_src>

<mosaic_0001>
module attributes {stable_mosaic.version = 11 : i64} {
  func.func @_fused_mm_kernel(%arg0: i32, %arg1: i32, %arg2: i32, %arg3: memref<32x128xbf16, #tpu.memory_space<vmem>>, %arg4: memref<128x128xbf16, #tpu.memory_space<vmem>>, %arg5: memref<1x128xf32, #tpu.memory_space<vmem>>, %arg6: memref<1x128xf32, #tpu.memory_space<vmem>>, %arg7: memref<32x128xf32, #tpu.memory_space<vmem>>, %arg8: memref<32x128xf32, #tpu.memory_space<vmem>>) attributes {dimension_semantics = [#tpu.dimension_semantics<parallel>, #tpu.dimension_semantics<parallel>, #tpu.dimension_semantics<arbitrary>], iteration_bounds = array<i64: 1, 1, 1>, scalar_prefetch = 0 : i64, scratch_operands = 1 : i64, tpu.core_type = #tpu.core_type<tc>, window_params = [{transform_indices = @transform_0, window_bounds = array<i64: 32, 128>}, {transform_indices = @transform_1, window_bounds = array<i64: 128, 128>}, {transform_indices = @transform_2, window_bounds = array<i64: 1, 128>}, {transform_indices = @transform_3, window_bounds = array<i64: 1, 128>}, {transform_indices = @transform_4, window_bounds = array<i64: 32, 128>}]} {
    %c0_i32 = arith.constant 0 : i32
    %0 = arith.cmpi eq, %arg2, %c0_i32 : i32
    %1 = arith.extui %0 : i1 to i32
    %c0_i32_0 = arith.constant 0 : i32
    %2 = arith.cmpi ne, %1, %c0_i32_0 : i32
    scf.if %2 {
      %cst_10 = arith.constant 0.000000e+00 : f32
      %12 = vector.broadcast %cst_10 : f32 to vector<32x128xf32>
      %c0_11 = arith.constant 0 : index
      %c0_12 = arith.constant 0 : index
      %13 = vector.load %arg8[%c0_11, %c0_12] : memref<32x128xf32, #tpu.memory_space<vmem>>, vector<32x128xf32>
      tpu.vector_store %arg8[%c0_11, %c0_12], %12 {strides = array<i32>} : memref<32x128xf32, #tpu.memory_space<vmem>>, vector<32x128xf32>,
    } else {
    }
    %c0 = arith.constant 0 : index
    %c0_1 = arith.constant 0 : index
    %3 = vector.load %arg8[%c0, %c0_1] : memref<32x128xf32, #tpu.memory_space<vmem>>, vector<32x128xf32>
    %c0_2 = arith.constant 0 : index
    %c0_3 = arith.constant 0 : index
    %4 = vector.load %arg3[%c0_2, %c0_3] : memref<32x128xbf16, #tpu.memory_space<vmem>>, vector<32x128xbf16>
    %c0_4 = arith.constant 0 : index
    %c0_5 = arith.constant 0 : index
    %5 = vector.load %arg4[%c0_4, %c0_5] : memref<128x128xbf16, #tpu.memory_space<vmem>>, vector<128x128xbf16>
    %cst = arith.constant dense<0.000000e+00> : vector<32x128xf32>
    %6 = tpu.matmul %4, %5, %cst {dimension_numbers = #tpu.dot_dimension_numbers<[1], [0], [0], [1], [0, 0, 1, 1], [], []>} : vector<32x128xbf16>, vector<128x128xbf16>, vector<32x128xf32> -> vector<32x128xf32>
    %7 = arith.addf %3, %6 : vector<32x128xf32>
    %c0_6 = arith.constant 0 : index
    %c0_7 = arith.constant 0 : index
    %8 = vector.load %arg8[%c0_6, %c0_7] : memref<32x128xf32, #tpu.memory_space<vmem>>, vector<32x128xf32>
    tpu.vector_store %arg8[%c0_6, %c0_7], %7 {strides = array<i32>} : memref<32x128xf32, #tpu.memory_space<vmem>>, vector<32x128xf32>,
    %c0_i32_8 = arith.constant 0 : i32
    %9 = arith.cmpi eq, %arg2, %c0_i32_8 : i32
    %10 = arith.extui %9 : i1 to i32
    %c0_i32_9 = arith.constant 0 : i32
    %11 = arith.cmpi ne, %10, %c0_i32_9 : i32
    scf.if %11 {
      %c0_10 = arith.constant 0 : index
      %c0_11 = arith.constant 0 : index
      %12 = vector.load %arg8[%c0_10, %c0_11] : memref<32x128xf32, #tpu.memory_space<vmem>>, vector<32x128xf32>
      %c0_12 = arith.constant 0 : index
      %c0_13 = arith.constant 0 : index
      %13 = vector.load %arg5[%c0_12, %c0_13] : memref<1x128xf32, #tpu.memory_space<vmem>>, vector<1x128xf32>
      %14 = vector.broadcast %13 : vector<1x128xf32> to vector<32x128xf32>
      %15 = arith.mulf %12, %14 : vector<32x128xf32>
      %c0_14 = arith.constant 0 : index
      %c0_15 = arith.constant 0 : index
      %16 = vector.load %arg6[%c0_14, %c0_15] : memref<1x128xf32, #tpu.memory_space<vmem>>, vector<1x128xf32>
      %17 = vector.broadcast %16 : vector<1x128xf32> to vector<32x128xf32>
      %18 = arith.addf %15, %17 : vector<32x128xf32>
      %cst_16 = arith.constant 0.000000e+00 : f32
      %19 = vector.broadcast %cst_16 : f32 to vector<32x128xf32>
      %20 = arith.maximumf %18, %19 : vector<32x128xf32>
      %c0_17 = arith.constant 0 : index
      %c0_18 = arith.constant 0 : index
      %21 = vector.load %arg7[%c0_17, %c0_18] : memref<32x128xf32, #tpu.memory_space<vmem>>, vector<32x128xf32>
      tpu.vector_store %arg7[%c0_17, %c0_18], %20 {strides = array<i32>} : memref<32x128xf32, #tpu.memory_space<vmem>>, vector<32x128xf32>,
    } else {
    }
    return
  }
  func.func @transform_0(%arg0: i32, %arg1: i32, %arg2: i32) -> (i32, i32) {
    %c0_i32 = arith.constant 0 : i32
    return %arg0, %arg2 : i32, i32
  }
  func.func @transform_1(%arg0: i32, %arg1: i32, %arg2: i32) -> (i32, i32) {
    %c0_i32 = arith.constant 0 : i32
    return %arg2, %arg1 : i32, i32
  }
  func.func @transform_2(%arg0: i32, %arg1: i32, %arg2: i32) -> (i32, i32) {
    %c0_i32 = arith.constant 0 : i32
    %c0_i32_0 = arith.constant 0 : i32
    return %c0_i32, %arg1 : i32, i32
  }
  func.func @transform_3(%arg0: i32, %arg1: i32, %arg2: i32) -> (i32, i32) {
    %c0_i32 = arith.constant 0 : i32
    %c0_i32_0 = arith.constant 0 : i32
    return %c0_i32, %arg1 : i32, i32
  }
  func.func @transform_4(%arg0: i32, %arg1: i32, %arg2: i32) -> (i32, i32) {
    %c0_i32 = arith.constant 0 : i32
    return %arg0, %arg1 : i32, i32
  }
}

module attributes {stable_mosaic.version = 11 : i64} {
  func.func @_fused_mm_kernel(%arg0: i32, %arg1: i32, %arg2: i32, %arg3: memref<16x128xbf16, #tpu.memory_space<vmem>>, %arg4: memref<128x128xbf16, #tpu.memory_space<vmem>>, %arg5: memref<1x128xf32, #tpu.memory_space<vmem>>, %arg6: memref<1x128xf32, #tpu.memory_space<vmem>>, %arg7: memref<16x128xf32, #tpu.memory_space<vmem>>, %arg8: memref<16x128xf32, #tpu.memory_space<vmem>>) attributes {dimension_semantics = [#tpu.dimension_semantics<parallel>, #tpu.dimension_semantics<parallel>, #tpu.dimension_semantics<arbitrary>], iteration_bounds = array<i64: 1, 1, 1>, scalar_prefetch = 0 : i64, scratch_operands = 1 : i64, tpu.core_type = #tpu.core_type<tc>, window_params = [{transform_indices = @transform_0, window_bounds = array<i64: 16, 128>}, {transform_indices = @transform_1, window_bounds = array<i64: 128, 128>}, {transform_indices = @transform_2, window_bounds = array<i64: 1, 128>}, {transform_indices = @transform_3, window_bounds = array<i64: 1, 128>}, {transform_indices = @transform_4, window_bounds = array<i64: 16, 128>}]} {
    %c0_i32 = arith.constant 0 : i32
    %0 = arith.cmpi eq, %arg2, %c0_i32 : i32
    %1 = arith.extui %0 : i1 to i32
    %c0_i32_0 = arith.constant 0 : i32
    %2 = arith.cmpi ne, %1, %c0_i32_0 : i32
    scf.if %2 {
      %cst_10 = arith.constant 0.000000e+00 : f32
      %12 = vector.broadcast %cst_10 : f32 to vector<16x128xf32>
      %c0_11 = arith.constant 0 : index
      %c0_12 = arith.constant 0 : index
      %13 = vector.load %arg8[%c0_11, %c0_12] : memref<16x128xf32, #tpu.memory_space<vmem>>, vector<16x128xf32>
      tpu.vector_store %arg8[%c0_11, %c0_12], %12 {strides = array<i32>} : memref<16x128xf32, #tpu.memory_space<vmem>>, vector<16x128xf32>,
    } else {
    }
    %c0 = arith.constant 0 : index
    %c0_1 = arith.constant 0 : index
    %3 = vector.load %arg8[%c0, %c0_1] : memref<16x128xf32, #tpu.memory_space<vmem>>, vector<16x128xf32>
    %c0_2 = arith.constant 0 : index
    %c0_3 = arith.constant 0 : index
    %4 = vector.load %arg3[%c0_2, %c0_3] : memref<16x128xbf16, #tpu.memory_space<vmem>>, vector<16x128xbf16>
    %c0_4 = arith.constant 0 : index
    %c0_5 = arith.constant 0 : index
    %5 = vector.load %arg4[%c0_4, %c0_5] : memref<128x128xbf16, #tpu.memory_space<vmem>>, vector<128x128xbf16>
    %cst = arith.constant dense<0.000000e+00> : vector<16x128xf32>
    %6 = tpu.matmul %4, %5, %cst {dimension_numbers = #tpu.dot_dimension_numbers<[1], [0], [0], [1], [0, 0, 1, 1], [], []>} : vector<16x128xbf16>, vector<128x128xbf16>, vector<16x128xf32> -> vector<16x128xf32>
    %7 = arith.addf %3, %6 : vector<16x128xf32>
    %c0_6 = arith.constant 0 : index
    %c0_7 = arith.constant 0 : index
    %8 = vector.load %arg8[%c0_6, %c0_7] : memref<16x128xf32, #tpu.memory_space<vmem>>, vector<16x128xf32>
    tpu.vector_store %arg8[%c0_6, %c0_7], %7 {strides = array<i32>} : memref<16x128xf32, #tpu.memory_space<vmem>>, vector<16x128xf32>,
    %c0_i32_8 = arith.constant 0 : i32
    %9 = arith.cmpi eq, %arg2, %c0_i32_8 : i32
    %10 = arith.extui %9 : i1 to i32
    %c0_i32_9 = arith.constant 0 : i32
    %11 = arith.cmpi ne, %10, %c0_i32_9 : i32
    scf.if %11 {
      %c0_10 = arith.constant 0 : index
      %c0_11 = arith.constant 0 : index
      %12 = vector.load %arg8[%c0_10, %c0_11] : memref<16x128xf32, #tpu.memory_space<vmem>>, vector<16x128xf32>
      %c0_12 = arith.constant 0 : index
      %c0_13 = arith.constant 0 : index
      %13 = vector.load %arg5[%c0_12, %c0_13] : memref<1x128xf32, #tpu.memory_space<vmem>>, vector<1x128xf32>
      %14 = vector.broadcast %13 : vector<1x128xf32> to vector<16x128xf32>
      %15 = arith.mulf %12, %14 : vector<16x128xf32>
      %c0_14 = arith.constant 0 : index
      %c0_15 = arith.constant 0 : index
      %16 = vector.load %arg6[%c0_14, %c0_15] : memref<1x128xf32, #tpu.memory_space<vmem>>, vector<1x128xf32>
      %17 = vector.broadcast %16 : vector<1x128xf32> to vector<16x128xf32>
      %18 = arith.addf %15, %17 : vector<16x128xf32>
      %cst_16 = arith.constant 0.000000e+00 : f32
      %19 = vector.broadcast %cst_16 : f32 to vector<16x128xf32>
      %20 = arith.maximumf %18, %19 : vector<16x128xf32>
      %c0_17 = arith.constant 0 : index
      %c0_18 = arith.constant 0 : index
      %21 = vector.load %arg7[%c0_17, %c0_18] : memref<16x128xf32, #tpu.memory_space<vmem>>, vector<16x128xf32>
      tpu.vector_store %arg7[%c0_17, %c0_18], %20 {strides = array<i32>} : memref<16x128xf32, #tpu.memory_space<vmem>>, vector<16x128xf32>,
    } else {
    }
    return
  }
  func.func @transform_0(%arg0: i32, %arg1: i32, %arg2: i32) -> (i32, i32) {
    %c0_i32 = arith.constant 0 : i32
    return %arg0, %arg2 : i32, i32
  }
  func.func @transform_1(%arg0: i32, %arg1: i32, %arg2: i32) -> (i32, i32) {
    %c0_i32 = arith.constant 0 : i32
    return %arg2, %arg1 : i32, i32
  }
  func.func @transform_2(%arg0: i32, %arg1: i32, %arg2: i32) -> (i32, i32) {
    %c0_i32 = arith.constant 0 : i32
    %c0_i32_0 = arith.constant 0 : i32
    return %c0_i32, %arg1 : i32, i32
  }
  func.func @transform_3(%arg0: i32, %arg1: i32, %arg2: i32) -> (i32, i32) {
    %c0_i32 = arith.constant 0 : i32
    %c0_i32_0 = arith.constant 0 : i32
    return %c0_i32, %arg1 : i32, i32
  }
  func.func @transform_4(%arg0: i32, %arg1: i32, %arg2: i32) -> (i32, i32) {
    %c0_i32 = arith.constant 0 : i32
    return %arg0, %arg1 : i32, i32
  }
}

module attributes {stable_mosaic.version = 11 : i64} {
  func.func @_edge_msg_scatter_kernel(%arg0: i32, %arg1: memref<32xi32, #tpu.memory_space<smem>>, %arg2: memref<32xi32, #tpu.memory_space<smem>>, %arg3: memref<16x128xf32, #tpu.memory_space<vmem>>, %arg4: memref<32x128xf32, #tpu.memory_space<vmem>>, %arg5: memref<128x128xf32, #tpu.memory_space<vmem>>, %arg6: memref<128x128xf32, #tpu.memory_space<vmem>>, %arg7: memref<24x128xf32, #tpu.memory_space<vmem>>, %arg8: memref<32x128xf32, #tpu.memory_space<vmem>>, %arg9: memref<32x128xf32, #tpu.memory_space<vmem>>) attributes {dimension_semantics = [#tpu.dimension_semantics<arbitrary>], iteration_bounds = array<i64: 1>, scalar_prefetch = 2 : i64, scratch_operands = 2 : i64, tpu.core_type = #tpu.core_type<tc>, window_params = [{pipeline_mode = #tpu.pipeline_mode<synchronous>, transform_indices = @transform_0, window_bounds = array<i64: 16, 128>}, {transform_indices = @transform_1, window_bounds = array<i64: 32, 128>}, {pipeline_mode = #tpu.pipeline_mode<synchronous>, transform_indices = @transform_2, window_bounds = array<i64: 128, 128>}, {pipeline_mode = #tpu.pipeline_mode<synchronous>, transform_indices = @transform_3, window_bounds = array<i64: 128, 128>}, {pipeline_mode = #tpu.pipeline_mode<synchronous>, transform_indices = @transform_4, window_bounds = array<i64: 24, 128>}]} {
    %c0_i32 = arith.constant 0 : i32
    %0 = arith.cmpi eq, %arg0, %c0_i32 : i32
    %1 = arith.extui %0 : i1 to i32
    %c0_i32_0 = arith.constant 0 : i32
    %2 = arith.cmpi ne, %1, %c0_i32_0 : i32
    scf.if %2 {
      %cst_18 = arith.constant 0.000000e+00 : f32
      %14 = vector.broadcast %cst_18 : f32 to vector<24x128xf32>
      %c0_19 = arith.constant 0 : index
      %c0_20 = arith.constant 0 : index
      %15 = vector.load %arg7[%c0_19, %c0_20] : memref<24x128xf32, #tpu.memory_space<vmem>>, vector<24x128xf32>
      tpu.vector_store %arg7[%c0_19, %c0_20], %14 {strides = array<i32>} : memref<24x128xf32, #tpu.memory_space<vmem>>, vector<24x128xf32>,
    } else {
    }
    %c32_i32 = arith.constant 32 : i32
    %3 = arith.muli %arg0, %c32_i32 : i32
    %c0_i32_1 = arith.constant 0 : i32
    %c32_i32_2 = arith.constant 32 : i32
    %4 = arith.addi %c0_i32_1, %c32_i32_2 : i32
    %c1_i32 = arith.constant 1 : i32
    scf.for %arg10 = %c0_i32_1 to %4 step %c1_i32  : i32 {
      %14 = arith.addi %3, %arg10 : i32
      %15 = arith.index_cast %14 : i32 to index
      %16 = memref.load %arg1[%15] : memref<32xi32, #tpu.memory_space<smem>>
      %17 = arith.index_cast %16 : i32 to index
      %c0_18 = arith.constant 0 : index
      %18 = vector.load %arg3[%17, %c0_18] : memref<16x128xf32, #tpu.memory_space<vmem>>, vector<1x128xf32>
      %19 = arith.index_cast %arg10 : i32 to index
      %c0_19 = arith.constant 0 : index
      %20 = vector.load %arg8[%19, %c0_19] : memref<32x128xf32, #tpu.memory_space<vmem>>, vector<1x128xf32>
      tpu.vector_store %arg8[%19, %c0_19], %18 {strides = array<i32>} : memref<32x128xf32, #tpu.memory_space<vmem>>, vector<1x128xf32>,
    }
    %c32_i32_3 = arith.constant 32 : i32
    %c0 = arith.constant 0 : index
    %c0_4 = arith.constant 0 : index
    %5 = vector.load %arg8[%c0, %c0_4] : memref<32x128xf32, #tpu.memory_space<vmem>>, vector<32x128xf32>
    %c0_5 = arith.constant 0 : index
    %c0_6 = arith.constant 0 : index
    %6 = vector.load %arg5[%c0_5, %c0_6] : memref<128x128xf32, #tpu.memory_space<vmem>>, vector<128x128xf32>
    %cst = arith.constant dense<0.000000e+00> : vector<32x128xf32>
    %7 = tpu.matmul %5, %6, %cst {dimension_numbers = #tpu.dot_dimension_numbers<[1], [0], [0], [1], [0, 0, 1, 1], [], []>} : vector<32x128xf32>, vector<128x128xf32>, vector<32x128xf32> -> vector<32x128xf32>
    %c0_7 = arith.constant 0 : index
    %c0_8 = arith.constant 0 : index
    %8 = vector.load %arg4[%c0_7, %c0_8] : memref<32x128xf32, #tpu.memory_space<vmem>>, vector<32x128xf32>
    %c0_9 = arith.constant 0 : index
    %c0_10 = arith.constant 0 : index
    %9 = vector.load %arg6[%c0_9, %c0_10] : memref<128x128xf32, #tpu.memory_space<vmem>>, vector<128x128xf32>
    %cst_11 = arith.constant dense<0.000000e+00> : vector<32x128xf32>
    %10 = tpu.matmul %8, %9, %cst_11 {dimension_numbers = #tpu.dot_dimension_numbers<[1], [0], [0], [1], [0, 0, 1, 1], [], []>} : vector<32x128xf32>, vector<128x128xf32>, vector<32x128xf32> -> vector<32x128xf32>
    %11 = arith.addf %7, %10 : vector<32x128xf32>
    %c0_12 = arith.constant 0 : index
    %c0_13 = arith.constant 0 : index
    %12 = vector.load %arg9[%c0_12, %c0_13] : memref<32x128xf32, #tpu.memory_space<vmem>>, vector<32x128xf32>
    tpu.vector_store %arg9[%c0_12, %c0_13], %11 {strides = array<i32>} : memref<32x128xf32, #tpu.memory_space<vmem>>, vector<32x128xf32>,
    %c0_i32_14 = arith.constant 0 : i32
    %c32_i32_15 = arith.constant 32 : i32
    %13 = arith.addi %c0_i32_14, %c32_i32_15 : i32
    %c1_i32_16 = arith.constant 1 : i32
    scf.for %arg10 = %c0_i32_14 to %13 step %c1_i32_16  : i32 {
      %14 = arith.addi %3, %arg10 : i32
      %15 = arith.index_cast %14 : i32 to index
      %16 = memref.load %arg2[%15] : memref<32xi32, #tpu.memory_space<smem>>
      %17 = arith.index_cast %16 : i32 to index
      %c0_18 = arith.constant 0 : index
      %18 = vector.load %arg7[%17, %c0_18] : memref<24x128xf32, #tpu.memory_space<vmem>>, vector<1x128xf32>
      %19 = arith.index_cast %arg10 : i32 to index
      %c0_19 = arith.constant 0 : index
      %20 = vector.load %arg9[%19, %c0_19] : memref<32x128xf32, #tpu.memory_space<vmem>>, vector<1x128xf32>
      %21 = arith.addf %18, %20 : vector<1x128xf32>
      %22 = arith.index_cast %16 : i32 to index
      %c0_20 = arith.constant 0 : index
      %23 = vector.load %arg7[%22, %c0_20] : memref<24x128xf32, #tpu.memory_space<vmem>>, vector<1x128xf32>
      tpu.vector_store %arg7[%22, %c0_20], %21 {strides = array<i32>} : memref<24x128xf32, #tpu.memory_space<vmem>>, vector<1x128xf32>,
    }
    %c32_i32_17 = arith.constant 32 : i32
    return
  }
  func.func @transform_0(%arg0: i32, %arg1: memref<32xi32, #tpu.memory_space<smem>>, %arg2: memref<32xi32, #tpu.memory_space<smem>>) -> (i32, i32) {
    %c0_i32 = arith.constant 0 : i32
    %c0_i32_0 = arith.constant 0 : i32
    %c0_i32_1 = arith.constant 0 : i32
    return %c0_i32, %c0_i32_0 : i32, i32
  }
  func.func @transform_1(%arg0: i32, %arg1: memref<32xi32, #tpu.memory_space<smem>>, %arg2: memref<32xi32, #tpu.memory_space<smem>>) -> (i32, i32) {
    %c0_i32 = arith.constant 0 : i32
    %c0_i32_0 = arith.constant 0 : i32
    return %arg0, %c0_i32 : i32, i32
  }
  func.func @transform_2(%arg0: i32, %arg1: memref<32xi32, #tpu.memory_space<smem>>, %arg2: memref<32xi32, #tpu.memory_space<smem>>) -> (i32, i32) {
    %c0_i32 = arith.constant 0 : i32
    %c0_i32_0 = arith.constant 0 : i32
    %c0_i32_1 = arith.constant 0 : i32
    return %c0_i32, %c0_i32_0 : i32, i32
  }
  func.func @transform_3(%arg0: i32, %arg1: memref<32xi32, #tpu.memory_space<smem>>, %arg2: memref<32xi32, #tpu.memory_space<smem>>) -> (i32, i32) {
    %c0_i32 = arith.constant 0 : i32
    %c0_i32_0 = arith.constant 0 : i32
    %c0_i32_1 = arith.constant 0 : i32
    return %c0_i32, %c0_i32_0 : i32, i32
  }
  func.func @transform_4(%arg0: i32, %arg1: memref<32xi32, #tpu.memory_space<smem>>, %arg2: memref<32xi32, #tpu.memory_space<smem>>) -> (i32, i32) {
    %c0_i32 = arith.constant 0 : i32
    %c0_i32_0 = arith.constant 0 : i32
    %c0_i32_1 = arith.constant 0 : i32
    return %c0_i32, %c0_i32_0 : i32, i32
  }
}

module attributes {stable_mosaic.version = 11 : i64} {
  func.func @_fused_mm_kernel(%arg0: i32, %arg1: i32, %arg2: i32, %arg3: memref<16x128xbf16, #tpu.memory_space<vmem>>, %arg4: memref<128x128xbf16, #tpu.memory_space<vmem>>, %arg5: memref<16x128xf32, #tpu.memory_space<vmem>>, %arg6: memref<1x128xf32, #tpu.memory_space<vmem>>, %arg7: memref<1x128xf32, #tpu.memory_space<vmem>>, %arg8: memref<16x128xf32, #tpu.memory_space<vmem>>, %arg9: memref<16x128xf32, #tpu.memory_space<vmem>>) attributes {dimension_semantics = [#tpu.dimension_semantics<parallel>, #tpu.dimension_semantics<parallel>, #tpu.dimension_semantics<arbitrary>], iteration_bounds = array<i64: 1, 1, 1>, scalar_prefetch = 0 : i64, scratch_operands = 1 : i64, tpu.core_type = #tpu.core_type<tc>, window_params = [{transform_indices = @transform_0, window_bounds = array<i64: 16, 128>}, {transform_indices = @transform_1, window_bounds = array<i64: 128, 128>}, {transform_indices = @transform_2, window_bounds = array<i64: 16, 128>}, {transform_indices = @transform_3, window_bounds = array<i64: 1, 128>}, {transform_indices = @transform_4, window_bounds = array<i64: 1, 128>}, {transform_indices = @transform_5, window_bounds = array<i64: 16, 128>}]} {
    %c0_i32 = arith.constant 0 : i32
    %0 = arith.cmpi eq, %arg2, %c0_i32 : i32
    %1 = arith.extui %0 : i1 to i32
    %c0_i32_0 = arith.constant 0 : i32
    %2 = arith.cmpi ne, %1, %c0_i32_0 : i32
    scf.if %2 {
      %cst_10 = arith.constant 0.000000e+00 : f32
      %12 = vector.broadcast %cst_10 : f32 to vector<16x128xf32>
      %c0_11 = arith.constant 0 : index
      %c0_12 = arith.constant 0 : index
      %13 = vector.load %arg9[%c0_11, %c0_12] : memref<16x128xf32, #tpu.memory_space<vmem>>, vector<16x128xf32>
      tpu.vector_store %arg9[%c0_11, %c0_12], %12 {strides = array<i32>} : memref<16x128xf32, #tpu.memory_space<vmem>>, vector<16x128xf32>,
    } else {
    }
    %c0 = arith.constant 0 : index
    %c0_1 = arith.constant 0 : index
    %3 = vector.load %arg9[%c0, %c0_1] : memref<16x128xf32, #tpu.memory_space<vmem>>, vector<16x128xf32>
    %c0_2 = arith.constant 0 : index
    %c0_3 = arith.constant 0 : index
    %4 = vector.load %arg3[%c0_2, %c0_3] : memref<16x128xbf16, #tpu.memory_space<vmem>>, vector<16x128xbf16>
    %c0_4 = arith.constant 0 : index
    %c0_5 = arith.constant 0 : index
    %5 = vector.load %arg4[%c0_4, %c0_5] : memref<128x128xbf16, #tpu.memory_space<vmem>>, vector<128x128xbf16>
    %cst = arith.constant dense<0.000000e+00> : vector<16x128xf32>
    %6 = tpu.matmul %4, %5, %cst {dimension_numbers = #tpu.dot_dimension_numbers<[1], [0], [0], [1], [0, 0, 1, 1], [], []>} : vector<16x128xbf16>, vector<128x128xbf16>, vector<16x128xf32> -> vector<16x128xf32>
    %7 = arith.addf %3, %6 : vector<16x128xf32>
    %c0_6 = arith.constant 0 : index
    %c0_7 = arith.constant 0 : index
    %8 = vector.load %arg9[%c0_6, %c0_7] : memref<16x128xf32, #tpu.memory_space<vmem>>, vector<16x128xf32>
    tpu.vector_store %arg9[%c0_6, %c0_7], %7 {strides = array<i32>} : memref<16x128xf32, #tpu.memory_space<vmem>>, vector<16x128xf32>,
    %c0_i32_8 = arith.constant 0 : i32
    %9 = arith.cmpi eq, %arg2, %c0_i32_8 : i32
    %10 = arith.extui %9 : i1 to i32
    %c0_i32_9 = arith.constant 0 : i32
    %11 = arith.cmpi ne, %10, %c0_i32_9 : i32
    scf.if %11 {
      %c0_10 = arith.constant 0 : index
      %c0_11 = arith.constant 0 : index
      %12 = vector.load %arg9[%c0_10, %c0_11] : memref<16x128xf32, #tpu.memory_space<vmem>>, vector<16x128xf32>
      %c0_12 = arith.constant 0 : index
      %c0_13 = arith.constant 0 : index
      %13 = vector.load %arg5[%c0_12, %c0_13] : memref<16x128xf32, #tpu.memory_space<vmem>>, vector<16x128xf32>
      %14 = arith.addf %12, %13 : vector<16x128xf32>
      %c0_14 = arith.constant 0 : index
      %c0_15 = arith.constant 0 : index
      %15 = vector.load %arg6[%c0_14, %c0_15] : memref<1x128xf32, #tpu.memory_space<vmem>>, vector<1x128xf32>
      %16 = vector.broadcast %15 : vector<1x128xf32> to vector<16x128xf32>
      %17 = arith.mulf %14, %16 : vector<16x128xf32>
      %c0_16 = arith.constant 0 : index
      %c0_17 = arith.constant 0 : index
      %18 = vector.load %arg7[%c0_16, %c0_17] : memref<1x128xf32, #tpu.memory_space<vmem>>, vector<1x128xf32>
      %19 = vector.broadcast %18 : vector<1x128xf32> to vector<16x128xf32>
      %20 = arith.addf %17, %19 : vector<16x128xf32>
      %c0_18 = arith.constant 0 : index
      %c0_19 = arith.constant 0 : index
      %21 = vector.load %arg8[%c0_18, %c0_19] : memref<16x128xf32, #tpu.memory_space<vmem>>, vector<16x128xf32>
      tpu.vector_store %arg8[%c0_18, %c0_19], %20 {strides = array<i32>} : memref<16x128xf32, #tpu.memory_space<vmem>>, vector<16x128xf32>,
    } else {
    }
    return
  }
  func.func @transform_0(%arg0: i32, %arg1: i32, %arg2: i32) -> (i32, i32) {
    %c0_i32 = arith.constant 0 : i32
    return %arg0, %arg2 : i32, i32
  }
  func.func @transform_1(%arg0: i32, %arg1: i32, %arg2: i32) -> (i32, i32) {
    %c0_i32 = arith.constant 0 : i32
    return %arg2, %arg1 : i32, i32
  }
  func.func @transform_2(%arg0: i32, %arg1: i32, %arg2: i32) -> (i32, i32) {
    %c0_i32 = arith.constant 0 : i32
    return %arg0, %arg1 : i32, i32
  }
  func.func @transform_3(%arg0: i32, %arg1: i32, %arg2: i32) -> (i32, i32) {
    %c0_i32 = arith.constant 0 : i32
    %c0_i32_0 = arith.constant 0 : i32
    return %c0_i32, %arg1 : i32, i32
  }
  func.func @transform_4(%arg0: i32, %arg1: i32, %arg2: i32) -> (i32, i32) {
    %c0_i32 = arith.constant 0 : i32
    %c0_i32_0 = arith.constant 0 : i32
    return %c0_i32, %arg1 : i32, i32
  }
  func.func @transform_5(%arg0: i32, %arg1: i32, %arg2: i32) -> (i32, i32) {
    %c0_i32 = arith.constant 0 : i32
    return %arg0, %arg1 : i32, i32
  }
}

module attributes {stable_mosaic.version = 11 : i64} {
  func.func @_pool_bn_relu_kernel(%arg0: i32, %arg1: memref<16xi32, #tpu.memory_space<smem>>, %arg2: memref<16x128xf32, #tpu.memory_space<vmem>>, %arg3: memref<1x128xf32, #tpu.memory_space<vmem>>, %arg4: memref<1x128xf32, #tpu.memory_space<vmem>>, %arg5: memref<8x128xf32, #tpu.memory_space<vmem>>) attributes {dimension_semantics = [#tpu.dimension_semantics<arbitrary>], iteration_bounds = array<i64: 1>, scalar_prefetch = 1 : i64, scratch_operands = 0 : i64, tpu.core_type = #tpu.core_type<tc>, window_params = [{transform_indices = @transform_0, window_bounds = array<i64: 16, 128>}, {pipeline_mode = #tpu.pipeline_mode<synchronous>, transform_indices = @transform_1, window_bounds = array<i64: 1, 128>}, {pipeline_mode = #tpu.pipeline_mode<synchronous>, transform_indices = @transform_2, window_bounds = array<i64: 1, 128>}, {pipeline_mode = #tpu.pipeline_mode<synchronous>, transform_indices = @transform_3, window_bounds = array<i64: 8, 128>}]} {
    %c0_i32 = arith.constant 0 : i32
    %0 = arith.cmpi eq, %arg0, %c0_i32 : i32
    %1 = arith.extui %0 : i1 to i32
    %c0_i32_0 = arith.constant 0 : i32
    %2 = arith.cmpi ne, %1, %c0_i32_0 : i32
    scf.if %2 {
      %cst = arith.constant 0.000000e+00 : f32
      %8 = vector.broadcast %cst : f32 to vector<8x128xf32>
      %c0 = arith.constant 0 : index
      %c0_6 = arith.constant 0 : index
      %9 = vector.load %arg5[%c0, %c0_6] : memref<8x128xf32, #tpu.memory_space<vmem>>, vector<8x128xf32>
      tpu.vector_store %arg5[%c0, %c0_6], %8 {strides = array<i32>} : memref<8x128xf32, #tpu.memory_space<vmem>>, vector<8x128xf32>,
    } else {
    }
    %c16_i32 = arith.constant 16 : i32
    %3 = arith.muli %arg0, %c16_i32 : i32
    %c0_i32_1 = arith.constant 0 : i32
    %c16_i32_2 = arith.constant 16 : i32
    %4 = arith.addi %c0_i32_1, %c16_i32_2 : i32
    %c1_i32 = arith.constant 1 : i32
    scf.for %arg6 = %c0_i32_1 to %4 step %c1_i32  : i32 {
      %8 = arith.addi %3, %arg6 : i32
      %9 = arith.index_cast %8 : i32 to index
      %10 = memref.load %arg1[%9] : memref<16xi32, #tpu.memory_space<smem>>
      %11 = arith.index_cast %10 : i32 to index
      %c0 = arith.constant 0 : index
      %12 = vector.load %arg5[%11, %c0] : memref<8x128xf32, #tpu.memory_space<vmem>>, vector<1x128xf32>
      %13 = arith.index_cast %arg6 : i32 to index
      %c0_6 = arith.constant 0 : index
      %14 = vector.load %arg2[%13, %c0_6] : memref<16x128xf32, #tpu.memory_space<vmem>>, vector<1x128xf32>
      %15 = arith.addf %12, %14 : vector<1x128xf32>
      %16 = arith.index_cast %10 : i32 to index
      %c0_7 = arith.constant 0 : index
      %17 = vector.load %arg5[%16, %c0_7] : memref<8x128xf32, #tpu.memory_space<vmem>>, vector<1x128xf32>
      tpu.vector_store %arg5[%16, %c0_7], %15 {strides = array<i32>} : memref<8x128xf32, #tpu.memory_space<vmem>>, vector<1x128xf32>,
    }
    %c16_i32_3 = arith.constant 16 : i32
    %c0_i32_4 = arith.constant 0 : i32
    %5 = arith.cmpi eq, %arg0, %c0_i32_4 : i32
    %6 = arith.extui %5 : i1 to i32
    %c0_i32_5 = arith.constant 0 : i32
    %7 = arith.cmpi ne, %6, %c0_i32_5 : i32
    scf.if %7 {
      %c0 = arith.constant 0 : index
      %c0_6 = arith.constant 0 : index
      %8 = vector.load %arg5[%c0, %c0_6] : memref<8x128xf32, #tpu.memory_space<vmem>>, vector<8x128xf32>
      %c0_7 = arith.constant 0 : index
      %c0_8 = arith.constant 0 : index
      %9 = vector.load %arg3[%c0_7, %c0_8] : memref<1x128xf32, #tpu.memory_space<vmem>>, vector<1x128xf32>
      %10 = vector.broadcast %9 : vector<1x128xf32> to vector<8x128xf32>
      %11 = arith.mulf %8, %10 : vector<8x128xf32>
      %c0_9 = arith.constant 0 : index
      %c0_10 = arith.constant 0 : index
      %12 = vector.load %arg4[%c0_9, %c0_10] : memref<1x128xf32, #tpu.memory_space<vmem>>, vector<1x128xf32>
      %13 = vector.broadcast %12 : vector<1x128xf32> to vector<8x128xf32>
      %14 = arith.addf %11, %13 : vector<8x128xf32>
      %cst = arith.constant 0.000000e+00 : f32
      %15 = vector.broadcast %cst : f32 to vector<8x128xf32>
      %16 = arith.maximumf %14, %15 : vector<8x128xf32>
      %c0_11 = arith.constant 0 : index
      %c0_12 = arith.constant 0 : index
      %17 = vector.load %arg5[%c0_11, %c0_12] : memref<8x128xf32, #tpu.memory_space<vmem>>, vector<8x128xf32>
      tpu.vector_store %arg5[%c0_11, %c0_12], %16 {strides = array<i32>} : memref<8x128xf32, #tpu.memory_space<vmem>>, vector<8x128xf32>,
    } else {
    }
    return
  }
  func.func @transform_0(%arg0: i32, %arg1: memref<16xi32, #tpu.memory_space<smem>>) -> (i32, i32) {
    %c0_i32 = arith.constant 0 : i32
    %c0_i32_0 = arith.constant 0 : i32
    return %arg0, %c0_i32 : i32, i32
  }
  func.func @transform_1(%arg0: i32, %arg1: memref<16xi32, #tpu.memory_space<smem>>) -> (i32, i32) {
    %c0_i32 = arith.constant 0 : i32
    %c0_i32_0 = arith.constant 0 : i32
    %c0_i32_1 = arith.constant 0 : i32
    return %c0_i32, %c0_i32_0 : i32, i32
  }
  func.func @transform_2(%arg0: i32, %arg1: memref<16xi32, #tpu.memory_space<smem>>) -> (i32, i32) {
    %c0_i32 = arith.constant 0 : i32
    %c0_i32_0 = arith.constant 0 : i32
    %c0_i32_1 = arith.constant 0 : i32
    return %c0_i32, %c0_i32_0 : i32, i32
  }
  func.func @transform_3(%arg0: i32, %arg1: memref<16xi32, #tpu.memory_space<smem>>) -> (i32, i32) {
    %c0_i32 = arith.constant 0 : i32
    %c0_i32_0 = arith.constant 0 : i32
    %c0_i32_1 = arith.constant 0 : i32
    return %c0_i32, %c0_i32_0 : i32, i32
  }
}

module attributes {stable_mosaic.version = 11 : i64} {
  func.func @_fused_mm_kernel(%arg0: i32, %arg1: i32, %arg2: i32, %arg3: memref<8x128xbf16, #tpu.memory_space<vmem>>, %arg4: memref<128x128xbf16, #tpu.memory_space<vmem>>, %arg5: memref<1x128xf32, #tpu.memory_space<vmem>>, %arg6: memref<1x128xf32, #tpu.memory_space<vmem>>, %arg7: memref<8x128xf32, #tpu.memory_space<vmem>>, %arg8: memref<8x128xf32, #tpu.memory_space<vmem>>) attributes {dimension_semantics = [#tpu.dimension_semantics<parallel>, #tpu.dimension_semantics<parallel>, #tpu.dimension_semantics<arbitrary>], iteration_bounds = array<i64: 1, 1, 1>, scalar_prefetch = 0 : i64, scratch_operands = 1 : i64, tpu.core_type = #tpu.core_type<tc>, window_params = [{transform_indices = @transform_0, window_bounds = array<i64: 8, 128>}, {transform_indices = @transform_1, window_bounds = array<i64: 128, 128>}, {transform_indices = @transform_2, window_bounds = array<i64: 1, 128>}, {transform_indices = @transform_3, window_bounds = array<i64: 1, 128>}, {transform_indices = @transform_4, window_bounds = array<i64: 8, 128>}]} {
    %c0_i32 = arith.constant 0 : i32
    %0 = arith.cmpi eq, %arg2, %c0_i32 : i32
    %1 = arith.extui %0 : i1 to i32
    %c0_i32_0 = arith.constant 0 : i32
    %2 = arith.cmpi ne, %1, %c0_i32_0 : i32
    scf.if %2 {
      %cst_10 = arith.constant 0.000000e+00 : f32
      %12 = vector.broadcast %cst_10 : f32 to vector<8x128xf32>
      %c0_11 = arith.constant 0 : index
      %c0_12 = arith.constant 0 : index
      %13 = vector.load %arg8[%c0_11, %c0_12] : memref<8x128xf32, #tpu.memory_space<vmem>>, vector<8x128xf32>
      tpu.vector_store %arg8[%c0_11, %c0_12], %12 {strides = array<i32>} : memref<8x128xf32, #tpu.memory_space<vmem>>, vector<8x128xf32>,
    } else {
    }
    %c0 = arith.constant 0 : index
    %c0_1 = arith.constant 0 : index
    %3 = vector.load %arg8[%c0, %c0_1] : memref<8x128xf32, #tpu.memory_space<vmem>>, vector<8x128xf32>
    %c0_2 = arith.constant 0 : index
    %c0_3 = arith.constant 0 : index
    %4 = vector.load %arg3[%c0_2, %c0_3] : memref<8x128xbf16, #tpu.memory_space<vmem>>, vector<8x128xbf16>
    %c0_4 = arith.constant 0 : index
    %c0_5 = arith.constant 0 : index
    %5 = vector.load %arg4[%c0_4, %c0_5] : memref<128x128xbf16, #tpu.memory_space<vmem>>, vector<128x128xbf16>
    %cst = arith.constant dense<0.000000e+00> : vector<8x128xf32>
    %6 = tpu.matmul %4, %5, %cst {dimension_numbers = #tpu.dot_dimension_numbers<[1], [0], [0], [1], [0, 0, 1, 1], [], []>} : vector<8x128xbf16>, vector<128x128xbf16>, vector<8x128xf32> -> vector<8x128xf32>
    %7 = arith.addf %3, %6 : vector<8x128xf32>
    %c0_6 = arith.constant 0 : index
    %c0_7 = arith.constant 0 : index
    %8 = vector.load %arg8[%c0_6, %c0_7] : memref<8x128xf32, #tpu.memory_space<vmem>>, vector<8x128xf32>
    tpu.vector_store %arg8[%c0_6, %c0_7], %7 {strides = array<i32>} : memref<8x128xf32, #tpu.memory_space<vmem>>, vector<8x128xf32>,
    %c0_i32_8 = arith.constant 0 : i32
    %9 = arith.cmpi eq, %arg2, %c0_i32_8 : i32
    %10 = arith.extui %9 : i1 to i32
    %c0_i32_9 = arith.constant 0 : i32
    %11 = arith.cmpi ne, %10, %c0_i32_9 : i32
    scf.if %11 {
      %c0_10 = arith.constant 0 : index
      %c0_11 = arith.constant 0 : index
      %12 = vector.load %arg8[%c0_10, %c0_11] : memref<8x128xf32, #tpu.memory_space<vmem>>, vector<8x128xf32>
      %c0_12 = arith.constant 0 : index
      %c0_13 = arith.constant 0 : index
      %13 = vector.load %arg5[%c0_12, %c0_13] : memref<1x128xf32, #tpu.memory_space<vmem>>, vector<1x128xf32>
      %14 = vector.broadcast %13 : vector<1x128xf32> to vector<8x128xf32>
      %15 = arith.mulf %12, %14 : vector<8x128xf32>
      %c0_14 = arith.constant 0 : index
      %c0_15 = arith.constant 0 : index
      %16 = vector.load %arg6[%c0_14, %c0_15] : memref<1x128xf32, #tpu.memory_space<vmem>>, vector<1x128xf32>
      %17 = vector.broadcast %16 : vector<1x128xf32> to vector<8x128xf32>
      %18 = arith.addf %15, %17 : vector<8x128xf32>
      %c0_16 = arith.constant 0 : index
      %c0_17 = arith.constant 0 : index
      %19 = vector.load %arg7[%c0_16, %c0_17] : memref<8x128xf32, #tpu.memory_space<vmem>>, vector<8x128xf32>
      tpu.vector_store %arg7[%c0_16, %c0_17], %18 {strides = array<i32>} : memref<8x128xf32, #tpu.memory_space<vmem>>, vector<8x128xf32>,
    } else {
    }
    return
  }
  func.func @transform_0(%arg0: i32, %arg1: i32, %arg2: i32) -> (i32, i32) {
    %c0_i32 = arith.constant 0 : i32
    return %arg0, %arg2 : i32, i32
  }
  func.func @transform_1(%arg0: i32, %arg1: i32, %arg2: i32) -> (i32, i32) {
    %c0_i32 = arith.constant 0 : i32
    return %arg2, %arg1 : i32, i32
  }
  func.func @transform_2(%arg0: i32, %arg1: i32, %arg2: i32) -> (i32, i32) {
    %c0_i32 = arith.constant 0 : i32
    %c0_i32_0 = arith.constant 0 : i32
    return %c0_i32, %arg1 : i32, i32
  }
  func.func @transform_3(%arg0: i32, %arg1: i32, %arg2: i32) -> (i32, i32) {
    %c0_i32 = arith.constant 0 : i32
    %c0_i32_0 = arith.constant 0 : i32
    return %c0_i32, %arg1 : i32, i32
  }
  func.func @transform_4(%arg0: i32, %arg1: i32, %arg2: i32) -> (i32, i32) {
    %c0_i32 = arith.constant 0 : i32
    return %arg0, %arg1 : i32, i32
  }
}

</mosaic_0001>

<bundles_post_ra>
// kernel: gnn_pred_e_forward.15
= control target key start
LH: loop header
LB: loop body
LE: loop exit
PB: predicated region body
PF: predicated region fallthrough
CT: control target
= control target key end

     0   :  { %s304_s1 = inlined_call_operand.vmem [shape: bf16[128,128], index: 1, kind: input, shape index: {}]   ;;  %s305_s2 = inlined_call_operand.vmem [shape: f32[1,128], index: 2, kind: input, shape index: {}]   ;;  %s306_s3 = inlined_call_operand.vmem [shape: f32[1,128], index: 3, kind: input, shape index: {}]   ;;  %s307_s0 = inlined_call_operand.vmem [shape: bf16[32,128], index: 0, kind: input, shape index: {}]   ;;  %s308_s4 = inlined_call_operand.vmem [shape: f32[32,128], index: 4, kind: output, shape index: {}]  }
   0x1   :  { %v220_v0 = vld [vmem:[%s304_s1 + $0x38] sm:$0xff]  ;;  %v219_v1 = vld [vmem:[%s304_s1 + $0x30] sm:$0xff]  ;;  %v218_v2 = vld [vmem:[%s304_s1 + $0x28] sm:$0xff] }
   0x2   :  { %109 = vmatpush.bf16.msra.mxu0 %v220_v0  ;;  %221 = vmatpush.bf16.msra.mxu1 %v220_v0  ;;  %v217_v3 = vld [vmem:[%s304_s1 + $0x20] sm:$0xff]  ;;  %v216_v4 = vld [vmem:[%s304_s1 + $0x18] sm:$0xff]  ;;  %v215_v5 = vld [vmem:[%s304_s1 + $0x10] sm:$0xff] }
   0x3   :  { %v214_v6 = vld [vmem:[%s304_s1 + $0x8] sm:$0xff]  ;;  %v213_v7 = vld [vmem:[%s304_s1] sm:$0xff] }
   0x4   :  { %v211_v8 = vld [vmem:[%s307_s0] sm:$0xff]  ;;  %v212_v9 = vld [vmem:[%s307_s0 + $0x8] sm:$0xff] }
   0x5   :  { %v229_v10 = vld [vmem:[%s305_s2] ss:$0 sm:$0xff] }
   0x6   :  { %110 = vmatpush.bf16.msra.mxu0 %v219_v1  ;;  %222 = vmatpush.bf16.msra.mxu1 %v219_v1  ;;  %v230_v11 = vld [vmem:[%s306_s3] ss:$0 sm:$0xff] }
   0xa   :  { %111 = vmatpush.bf16.msra.mxu0 %v218_v2  ;;  %223 = vmatpush.bf16.msra.mxu1 %v218_v2 }
   0xe   :  { %112 = vmatpush.bf16.msra.mxu0 %v217_v3  ;;  %224 = vmatpush.bf16.msra.mxu1 %v217_v3 }
  0x12   :  { %113 = vmatpush.bf16.msra.mxu0 %v216_v4  ;;  %225 = vmatpush.bf16.msra.mxu1 %v216_v4 }
  0x16   :  { %114 = vmatpush.bf16.msra.mxu0 %v215_v5  ;;  %226 = vmatpush.bf16.msra.mxu1 %v215_v5 }
  0x1a   :  { %115 = vmatpush.bf16.msra.mxu0 %v214_v6  ;;  %227 = vmatpush.bf16.msra.mxu1 %v214_v6 }
  0x1e   :  { %116 = vmatpush.bf16.msra.mxu0 %v213_v7  ;;  %228 = vmatpush.bf16.msra.mxu1 %v213_v7 }
  0x21   :  { %117 = vmatmul.bf16.vlgmr.msra.gmra.mxu0 %v211_v8  ;;  %122 = vmatmul.bf16.vlgmr.msra.gmra.mxu1 %v212_v9 }
  0x9e   :  { %v118_v12 = vpop.f32.mrf.mxu0  ;;  %v123_v13 = vpop.f32.mrf.mxu1 }
  0x9f   :  { %v147_v14 = vmul.f32 %v229_v10, %v118_v12  ;;  %v149_v15 = vmul.f32 %v229_v10, %v123_v13 }
  0xa1   :  { %v155_v16 = vadd.f32 %v230_v11, %v147_v14  ;;  %v157_v17 = vadd.f32 %v230_v11, %v149_v15 }
  0xa3   :  { %v159_v18 = vmax.f32 %v155_v16, 0.0  ;;  %v161_v19 = vmax.f32 %v157_v17, 0.0 }
  0xa5   :  { %163 = vst [vmem:[%s308_s4] sm:$0xff] %v159_v18 }
  0xa6   :  { %165 = vst [vmem:[%s308_s4 + $0x10] sm:$0xff] %v161_v19  ;;  %v120_v20 = vpop.f32.mrf.mxu0  ;;  %v125_v21 = vpop.f32.mrf.mxu1 }
  0xa7   :  { %v148_v22 = vmul.f32 %v229_v10, %v120_v20  ;;  %v150_v23 = vmul.f32 %v229_v10, %v125_v21 }
  0xa9   :  { %v156_v24 = vadd.f32 %v230_v11, %v148_v22  ;;  %v158_v25 = vadd.f32 %v230_v11, %v150_v23 }
  0xab   :  { %v160_v26 = vmax.f32 %v156_v24, 0.0  ;;  %v162_v27 = vmax.f32 %v158_v25, 0.0 }
  0xad   :  { %164 = vst [vmem:[%s308_s4 + $0x8] sm:$0xff] %v160_v26 }
  0xae   :  { %166 = vst [vmem:[%s308_s4 + $0x18] sm:$0xff] %v162_v27 }

// kernel: gnn_pred_e_forward.14
= control target key start
LH: loop header
LB: loop body
LE: loop exit
PB: predicated region body
PF: predicated region fallthrough
CT: control target
= control target key end

     0   :  { %s251_s1 = inlined_call_operand.vmem [shape: bf16[128,128], index: 1, kind: input, shape index: {}]   ;;  %s252_s2 = inlined_call_operand.vmem [shape: f32[1,128], index: 2, kind: input, shape index: {}]   ;;  %s253_s3 = inlined_call_operand.vmem [shape: f32[1,128], index: 3, kind: input, shape index: {}]   ;;  %s254_s0 = inlined_call_operand.vmem [shape: bf16[16,128], index: 0, kind: input, shape index: {}]   ;;  %s255_s4 = inlined_call_operand.vmem [shape: f32[16,128], index: 4, kind: output, shape index: {}]  }
   0x1   :  { %v184_v0 = vld [vmem:[%s251_s1 + $0x38] sm:$0xff]  ;;  %v183_v1 = vld [vmem:[%s251_s1 + $0x30] sm:$0xff]  ;;  %v182_v2 = vld [vmem:[%s251_s1 + $0x28] sm:$0xff] }
   0x2   :  { %97 = vmatpush.bf16.msra.mxu0 %v184_v0  ;;  %v181_v3 = vld [vmem:[%s251_s1 + $0x20] sm:$0xff]  ;;  %v180_v4 = vld [vmem:[%s251_s1 + $0x18] sm:$0xff]  ;;  %v179_v5 = vld [vmem:[%s251_s1 + $0x10] sm:$0xff] }
   0x3   :  { %v178_v6 = vld [vmem:[%s251_s1 + $0x8] sm:$0xff]  ;;  %v177_v7 = vld [vmem:[%s251_s1] sm:$0xff] }
   0x4   :  { %v176_v8 = vld [vmem:[%s254_s0] sm:$0xff] }
   0x5   :  { %v185_v9 = vld [vmem:[%s252_s2] ss:$0 sm:$0xff] }
   0x6   :  { %98 = vmatpush.bf16.msra.mxu0 %v183_v1  ;;  %v186_v10 = vld [vmem:[%s253_s3] ss:$0 sm:$0xff] }
   0xa   :  { %99 = vmatpush.bf16.msra.mxu0 %v182_v2 }
   0xe   :  { %100 = vmatpush.bf16.msra.mxu0 %v181_v3 }
  0x12   :  { %101 = vmatpush.bf16.msra.mxu0 %v180_v4 }
  0x16   :  { %102 = vmatpush.bf16.msra.mxu0 %v179_v5 }
  0x1a   :  { %103 = vmatpush.bf16.msra.mxu0 %v178_v6 }
  0x1e   :  { %104 = vmatpush.bf16.msra.mxu0 %v177_v7 }
  0x21   :  { %105 = vmatmul.bf16.vlgmr.msra.gmra.mxu0 %v176_v8 }
  0x9e   :  { %v106_v11 = vpop.f32.mrf.mxu0 }
  0x9f   :  { %v124_v12 = vmul.f32 %v185_v9, %v106_v11 }
  0xa1   :  { %v130_v13 = vadd.f32 %v186_v10, %v124_v12 }
  0xa3   :  { %v132_v14 = vmax.f32 %v130_v13, 0.0 }
  0xa5   :  { %134 = vst [vmem:[%s255_s4] sm:$0xff] %v132_v14 }
  0xa6   :  { %v108_v15 = vpop.f32.mrf.mxu0 }
  0xa7   :  { %v125_v16 = vmul.f32 %v185_v9, %v108_v15 }
  0xa9   :  { %v131_v17 = vadd.f32 %v186_v10, %v125_v16 }
  0xab   :  { %v133_v18 = vmax.f32 %v131_v17, 0.0 }
  0xad   :  { %135 = vst [vmem:[%s255_s4 + $0x8] sm:$0xff] %v133_v18 }

// kernel: gnn_pred_e_forward.16
= control target key start
LH: loop header
LB: loop body
LE: loop exit
PB: predicated region body
PF: predicated region fallthrough
CT: control target
= control target key end

     0   :  { %s279_s27 = smov [#allocation5]   ;;  %s280_s28 = smov [#allocation6]   ;;  %s446_s0 = inlined_call_operand.vmem [shape: s32[32], index: 0, kind: input, shape index: {}]   ;;  %s447_s2 = inlined_call_operand.vmem [shape: f32[16,128], index: 2, kind: input, shape index: {}]   ;;  %s448_s3 = inlined_call_operand.vmem [shape: f32[32,128], index: 3, kind: input, shape index: {}]   ;;  %s449_s4 = inlined_call_operand.vmem [shape: f32[128,128], index: 4, kind: input, shape index: {}]   ;;  %s450_s5 = inlined_call_operand.vmem [shape: f32[128,128], index: 5, kind: input, shape index: {}]   ;;  %s451_s6 = inlined_call_operand.vmem [shape: f32[24,128], index: 6, kind: output, shape index: {}]   ;;  %s452_s1 = inlined_call_operand.vmem [shape: s32[32], index: 1, kind: input, shape index: {}]  }
   0x1   :  { %s12_s23 = sshll.u32 %s446_s0, 4  ;;  %s17_s26 = sshll.u32 %s452_s1, 4  ;;  %s13_s23 = int_to_ptr.vmem [resolvable:$true] %s12_s23  ;;  %s18_s26 = int_to_ptr.vmem [resolvable:$true] %s17_s26 }
   0x2   :  { %15 = dma.vmem_to_smem %s13_s23, 16, %s279_s27, [#allocation4] }
   0x3   :  { %20 = dma.vmem_to_smem %s18_s26, 16, %s280_s28, [#allocation4] }
   0x4   :  { %269 = dma.done.wait [#allocation4], 32 }
   0x5   :  { %270 = vsyncadd [#allocation4], 4294967264 }
   0x6   :  { %23 = sfence }
   0x7   :  { %v281_v0 = vmov 0.0   ;;  %s271_s9 = smov 0  }
   0x8   :  { %36 = vst [vmem:[%s451_s6] sm:$0xff] %v281_v0 }
   0x9   :  { %37 = vst [vmem:[%s451_s6 + $0x8] sm:$0xff] %v281_v0 }
   0xa   :  { %38 = vst [vmem:[%s451_s6 + $0x10] sm:$0xff] %v281_v0 }
   0xb LB: > { %s47_s10 = sld [smem:[#allocation5 + %s273_s9]]  ;;  %s50_s14 = scalar_lea.vmem [#allocation2], %s273_s9  ;;  %s273_s9 = sphi %s271_s9, %s45_s9  }
   0xc   : > { %s45_s9 = sadd.s32 1, %s273_s9  }
   0xd   : > { %p42_p0 = scmp.ge.s32.totalorder %s45_s9, 32  }
   0xe   :  { %v91_v2 = vld [vmem:[%s450_s5 + $0x78] sm:$0xff] (%p42_p0)  ;;  %v90_v4 = vld [vmem:[%s450_s5 + $0x70] sm:$0xff] (%p42_p0)  ;;  %v89_v6 = vld [vmem:[%s450_s5 + $0x68] sm:$0xff] (%p42_p0) }
   0xf   :  { %44 = sbr.rel (!%p42_p0) target bundleno = 11 (0xb), region = 58  ;;  %v71_v3 = vld [vmem:[%s449_s4 + $0x78] sm:$0xff] (%p42_p0)  ;;  %186 = vmatpush.msra.mxu2 (%p42_p0), %v91_v2  ;;  %v70_v5 = vld [vmem:[%s449_s4 + $0x70] sm:$0xff] (%p42_p0)  ;;  %v69_v7 = vld [vmem:[%s449_s4 + $0x68] sm:$0xff] (%p42_p0)  ;;  %92 = vmatpush.msra.mxu0 (%p42_p0), %v91_v2 }
  0x10   :  { %202 = vmatpush.msra.mxu3 (%p42_p0), %v71_v3  ;;  %121 = vmatpush.msra.mxu1 (%p42_p0), %v71_v3  ;;  %v88_v8 = vld [vmem:[%s450_s5 + $0x60] sm:$0xff] (%p42_p0)  ;;  %v87_v10 = vld [vmem:[%s450_s5 + $0x58] sm:$0xff] (%p42_p0)  ;;  %v86_v12 = vld [vmem:[%s450_s5 + $0x50] sm:$0xff] (%p42_p0) }
  0x11   : > { %s48_s13 = scalar_lea.vmem %s447_s2, %s47_s10  ;;  %187 = vmatpush.msra.mxu2 (%p42_p0), %v90_v4  ;;  %v68_v9 = vld [vmem:[%s449_s4 + $0x60] sm:$0xff] (%p42_p0)  ;;  %93 = vmatpush.msra.mxu0 (%p42_p0), %v90_v4  ;;  %v67_v11 = vld [vmem:[%s449_s4 + $0x58] sm:$0xff] (%p42_p0)  ;;  %v66_v13 = vld [vmem:[%s449_s4 + $0x50] sm:$0xff] (%p42_p0) }
  0x12   : > { %v49_v1 = vld [vmem:[%s48_s13] sm:$0x1]  ;;  %203 = vmatpush.msra.mxu3 (%p42_p0), %v70_v5  ;;  %122 = vmatpush.msra.mxu1 (%p42_p0), %v70_v5  ;;  %v85_v14 = vld [vmem:[%s450_s5 + $0x48] sm:$0xff] (%p42_p0)  ;;  %v83_v18 = vld [vmem:[%s450_s5 + $0x38] sm:$0xff] (%p42_p0) }
  0x13   : > { %51 = vst [vmem:[%s50_s14] sm:$0x1] %v49_v1  ;;  %188 = vmatpush.msra.mxu2 (%p42_p0), %v89_v6  ;;  %94 = vmatpush.msra.mxu0 (%p42_p0), %v89_v6  ;;  %v65_v15 = vld [vmem:[%s449_s4 + $0x48] sm:$0xff] (%p42_p0)  ;;  %v84_v16 = vld [vmem:[%s450_s5 + $0x40] sm:$0xff] (%p42_p0)  ;;  %v63_v19 = vld [vmem:[%s449_s4 + $0x38] sm:$0xff] (%p42_p0) }
  0x14   :  { %204 = vmatpush.msra.mxu3 %v69_v7  ;;  %123 = vmatpush.msra.mxu1 %v69_v7  ;;  %v64_v17 = vld [vmem:[%s449_s4 + $0x40] sm:$0xff]  ;;  %v82_v20 = vld [vmem:[%s450_s5 + $0x30] sm:$0xff]  ;;  %v81_v22 = vld [vmem:[%s450_s5 + $0x28] sm:$0xff] }
  0x15   :  { %189 = vmatpush.msra.mxu2 %v88_v8  ;;  %95 = vmatpush.msra.mxu0 %v88_v8  ;;  %v62_v21 = vld [vmem:[%s449_s4 + $0x30] sm:$0xff]  ;;  %v61_v23 = vld [vmem:[%s449_s4 + $0x28] sm:$0xff]  ;;  %v80_v24 = vld [vmem:[%s450_s5 + $0x20] sm:$0xff] }
  0x16   :  { %205 = vmatpush.msra.mxu3 %v68_v9  ;;  %124 = vmatpush.msra.mxu1 %v68_v9  ;;  %v60_v25 = vld [vmem:[%s449_s4 + $0x20] sm:$0xff]  ;;  %v79_v26 = vld [vmem:[%s450_s5 + $0x18] sm:$0xff]  ;;  %v78_v28 = vld [vmem:[%s450_s5 + $0x10] sm:$0xff] }
  0x17   :  { %190 = vmatpush.msra.mxu2 %v87_v10  ;;  %96 = vmatpush.msra.mxu0 %v87_v10  ;;  %v59_v27 = vld [vmem:[%s449_s4 + $0x18] sm:$0xff]  ;;  %v58_v29 = vld [vmem:[%s449_s4 + $0x10] sm:$0xff]  ;;  %v77_v30 = vld [vmem:[%s450_s5 + $0x8] sm:$0xff] }
  0x18   :  { %206 = vmatpush.msra.mxu3 %v67_v11  ;;  %125 = vmatpush.msra.mxu1 %v67_v11  ;;  %v57_v31 = vld [vmem:[%s449_s4 + $0x8] sm:$0xff]  ;;  %v76_v32 = vld [vmem:[%s450_s5] sm:$0xff]  ;;  %v74_v34 = vld [vmem:[%s448_s3 + $0x10] sm:$0xff] }
  0x19   :  { %191 = vmatpush.msra.mxu2 %v86_v12  ;;  %97 = vmatpush.msra.mxu0 %v86_v12  ;;  %v56_v33 = vld [vmem:[%s449_s4] sm:$0xff]  ;;  %v75_v38 = vld [vmem:[%s448_s3 + $0x18] sm:$0xff]  ;;  %v73_v40 = vld [vmem:[%s448_s3 + $0x8] sm:$0xff] }
  0x1a   :  { %207 = vmatpush.msra.mxu3 %v66_v13  ;;  %126 = vmatpush.msra.mxu1 %v66_v13  ;;  %v54_v35 = vld [vmem:[#allocation2 + $0x10] sm:$0xff]  ;;  %v72_v36 = vld [vmem:[%s448_s3] sm:$0xff]  ;;  %v55_v39 = vld [vmem:[#allocation2 + $0x18] sm:$0xff]  ;;  %s275_s3 = smov 0  }
  0x1b   :  { %192 = vmatpush.msra.mxu2 %v85_v14  ;;  %98 = vmatpush.msra.mxu0 %v85_v14  ;;  %v52_v37 = vld [vmem:[#allocation2] sm:$0xff]  ;;  %v53_v41 = vld [vmem:[#allocation2 + $0x8] sm:$0xff] }
  0x1c   :  { %208 = vmatpush.msra.mxu3 %v65_v15  ;;  %127 = vmatpush.msra.mxu1 %v65_v15 }
  0x1d   :  { %193 = vmatpush.msra.mxu2 %v84_v16  ;;  %99 = vmatpush.msra.mxu0 %v84_v16 }
  0x1e   :  { %209 = vmatpush.msra.mxu3 %v64_v17  ;;  %128 = vmatpush.msra.mxu1 %v64_v17 }
  0x1f   :  { %194 = vmatpush.msra.mxu2 %v83_v18  ;;  %100 = vmatpush.msra.mxu0 %v83_v18 }
  0x20   :  { %210 = vmatpush.msra.mxu3 %v63_v19  ;;  %129 = vmatpush.msra.mxu1 %v63_v19 }
  0x21   :  { %195 = vmatpush.msra.mxu2 %v82_v20  ;;  %101 = vmatpush.msra.mxu0 %v82_v20 }
  0x22   :  { %211 = vmatpush.msra.mxu3 %v62_v21  ;;  %130 = vmatpush.msra.mxu1 %v62_v21 }
  0x23   :  { %196 = vmatpush.msra.mxu2 %v81_v22  ;;  %102 = vmatpush.msra.mxu0 %v81_v22 }
  0x24   :  { %212 = vmatpush.msra.mxu3 %v61_v23  ;;  %131 = vmatpush.msra.mxu1 %v61_v23 }
  0x25   :  { %197 = vmatpush.msra.mxu2 %v80_v24  ;;  %103 = vmatpush.msra.mxu0 %v80_v24 }
  0x26   :  { %213 = vmatpush.msra.mxu3 %v60_v25  ;;  %132 = vmatpush.msra.mxu1 %v60_v25 }
  0x27   :  { %198 = vmatpush.msra.mxu2 %v79_v26  ;;  %104 = vmatpush.msra.mxu0 %v79_v26 }
  0x28   :  { %214 = vmatpush.msra.mxu3 %v59_v27  ;;  %133 = vmatpush.msra.mxu1 %v59_v27 }
  0x29   :  { %199 = vmatpush.msra.mxu2 %v78_v28  ;;  %105 = vmatpush.msra.mxu0 %v78_v28 }
  0x2a   :  { %215 = vmatpush.msra.mxu3 %v58_v29  ;;  %134 = vmatpush.msra.mxu1 %v58_v29 }
  0x2b   :  { %200 = vmatpush.msra.mxu2 %v77_v30  ;;  %106 = vmatpush.msra.mxu0 %v77_v30 }
  0x2c   :  { %216 = vmatpush.msra.mxu3 %v57_v31  ;;  %135 = vmatpush.msra.mxu1 %v57_v31 }
  0x2d   :  { %201 = vmatpush.msra.mxu2 %v76_v32  ;;  %107 = vmatpush.msra.mxu0 %v76_v32 }
  0x2e   :  { %217 = vmatpush.msra.mxu3 %v56_v33  ;;  %114 = vmatmul.f32.vlgmr.msra.gmra.mxu2 %v74_v34 }
  0x2f   :  { %143 = vmatmul.f32.vlgmr.msra.gmra.mxu3 %v54_v35  ;;  %136 = vmatpush.msra.mxu1 %v56_v33 }
  0x30   :  { %108 = vmatmul.f32.vlgmr.msra.gmra.mxu0 %v72_v36  ;;  %137 = vmatmul.f32.vlgmr.msra.gmra.mxu1 %v52_v37 }
  0x36   :  { %117 = vmatmul.f32.gmra.mxu2 %v75_v38 }
  0x37   :  { %146 = vmatmul.f32.gmra.mxu3 %v55_v39 }
  0x38   :  { %111 = vmatmul.f32.gmra.mxu0 %v73_v40  ;;  %140 = vmatmul.f32.gmra.mxu1 %v53_v41 }
  0xad   :  { %v109_v42 = vpop.f32.mrf.mxu0  ;;  %v138_v43 = vpop.f32.mrf.mxu1 }
  0xae   :  { %v139_v44 = vadd.f32 %v138_v43, %v109_v42 }
  0xb0   :  { %150 = vst [vmem:[#allocation3] sm:$0xff] %v139_v44 }
  0xb1   :  { %v115_v45 = vpop.f32.mrf.mxu2 }
  0xb2   :  { %v144_v46 = vpop.f32.mrf.mxu3 }
  0xb3   :  { %v145_v47 = vadd.f32 %v144_v46, %v115_v45 }
  0xb5   :  { %152 = vst [vmem:[#allocation3 + $0x10] sm:$0xff] %v145_v47  ;;  %v112_v48 = vpop.f32.mrf.mxu0  ;;  %v141_v49 = vpop.f32.mrf.mxu1 }
  0xb6   :  { %v142_v50 = vadd.f32 %v141_v49, %v112_v48 }
  0xb8   :  { %151 = vst [vmem:[#allocation3 + $0x8] sm:$0xff] %v142_v50 }
  0xb9   :  { %v118_v51 = vpop.f32.mrf.mxu2 }
  0xba   :  { %v147_v52 = vpop.f32.mrf.mxu3 }
  0xbb   :  { %v148_v53 = vadd.f32 %v147_v52, %v118_v51 }
  0xbd   :  { %153 = vst [vmem:[#allocation3 + $0x18] sm:$0xff] %v148_v53 }
  0xbe LB: > { %s161_s30 = sld [smem:[#allocation6 + %s277_s3]]  ;;  %s164_s7 = scalar_lea.vmem [#allocation3], %s277_s3  ;;  %s277_s3 = sphi %s275_s3, %s159_s3  }
  0xbf   : > { %s159_s3 = sadd.s32 1, %s277_s3  }
  0xc0   : > { %p156_p1 = scmp.ge.s32.totalorder %s159_s3, 32  }
  0xc4   : > { %v165_v54 = vld [vmem:[%s164_s7] sm:$0x1]  ;;  %s162_s1 = scalar_lea.vmem %s451_s6, %s161_s30  ;;  %158 = sbr.rel (!%p156_p1) target bundleno = 190 (0xbe), region = 69 }
  0xc5   : > { %v163_v55 = vld [vmem:[%s162_s1] sm:$0x1] }
  0xc6   : > { %v166_v56 = vadd.f32 %v165_v54, %v163_v55 }
  0xc8   : > { %167 = vst [vmem:[%s162_s1] sm:$0x1] %v166_v56 }

// kernel: gnn_pred_e_forward.17
= control target key start
LH: loop header
LB: loop body
LE: loop exit
PB: predicated region body
PF: predicated region fallthrough
CT: control target
= control target key end

     0   :  { %s267_s1 = inlined_call_operand.vmem [shape: bf16[128,128], index: 1, kind: input, shape index: {}]   ;;  %s268_s3 = inlined_call_operand.vmem [shape: f32[1,128], index: 3, kind: input, shape index: {}]   ;;  %s269_s4 = inlined_call_operand.vmem [shape: f32[1,128], index: 4, kind: input, shape index: {}]   ;;  %s270_s0 = inlined_call_operand.vmem [shape: bf16[16,128], index: 0, kind: input, shape index: {}]   ;;  %s271_s2 = inlined_call_operand.vmem [shape: f32[16,128], index: 2, kind: input, shape index: {}]   ;;  %s272_s5 = inlined_call_operand.vmem [shape: f32[16,128], index: 5, kind: output, shape index: {}]  }
   0x1   :  { %v189_v0 = vld [vmem:[%s267_s1 + $0x38] sm:$0xff]  ;;  %v188_v1 = vld [vmem:[%s267_s1 + $0x30] sm:$0xff]  ;;  %v187_v2 = vld [vmem:[%s267_s1 + $0x28] sm:$0xff] }
   0x2   :  { %100 = vmatpush.bf16.msra.mxu0 %v189_v0  ;;  %v186_v3 = vld [vmem:[%s267_s1 + $0x20] sm:$0xff]  ;;  %v185_v4 = vld [vmem:[%s267_s1 + $0x18] sm:$0xff]  ;;  %v184_v5 = vld [vmem:[%s267_s1 + $0x10] sm:$0xff] }
   0x3   :  { %v183_v6 = vld [vmem:[%s267_s1 + $0x8] sm:$0xff]  ;;  %v182_v7 = vld [vmem:[%s267_s1] sm:$0xff] }
   0x4   :  { %v181_v8 = vld [vmem:[%s270_s0] sm:$0xff]  ;;  %v124_v16 = vld [vmem:[%s271_s2 + $0x8] sm:$0xff] }
   0x5   :  { %v123_v9 = vld [vmem:[%s271_s2] sm:$0xff] }
   0x6   :  { %101 = vmatpush.bf16.msra.mxu0 %v188_v1  ;;  %v190_v10 = vld [vmem:[%s268_s3] ss:$0 sm:$0xff] }
   0x7   :  { %v191_v13 = vld [vmem:[%s269_s4] ss:$0 sm:$0xff] }
   0xa   :  { %102 = vmatpush.bf16.msra.mxu0 %v187_v2 }
   0xe   :  { %103 = vmatpush.bf16.msra.mxu0 %v186_v3 }
  0x12   :  { %104 = vmatpush.bf16.msra.mxu0 %v185_v4 }
  0x16   :  { %105 = vmatpush.bf16.msra.mxu0 %v184_v5 }
  0x1a   :  { %106 = vmatpush.bf16.msra.mxu0 %v183_v6 }
  0x1e   :  { %107 = vmatpush.bf16.msra.mxu0 %v182_v7 }
  0x21   :  { %108 = vmatmul.bf16.vlgmr.msra.gmra.mxu0 %v181_v8 }
  0x9e   :  { %v109_v11 = vpop.f32.mrf.mxu0 }
  0x9f   :  { %v125_v12 = vadd.f32 %v123_v9, %v109_v11 }
  0xa1   :  { %v131_v14 = vmul.f32 %v190_v10, %v125_v12 }
  0xa3   :  { %v137_v15 = vadd.f32 %v191_v13, %v131_v14 }
  0xa5   :  { %139 = vst [vmem:[%s272_s5] sm:$0xff] %v137_v15 }
  0xa6   :  { %v111_v17 = vpop.f32.mrf.mxu0 }
  0xa7   :  { %v126_v18 = vadd.f32 %v124_v16, %v111_v17 }
  0xa9   :  { %v132_v19 = vmul.f32 %v190_v10, %v126_v18 }
  0xab   :  { %v138_v20 = vadd.f32 %v191_v13, %v132_v19 }
  0xad   :  { %140 = vst [vmem:[%s272_s5 + $0x8] sm:$0xff] %v138_v20 }

// kernel: gnn_pred_e_forward.26
= control target key start
LH: loop header
LB: loop body
LE: loop exit
PB: predicated region body
PF: predicated region fallthrough
CT: control target
= control target key end

     0   :  { %s104_s18 = smov [#allocation3]   ;;  %s155_s0 = inlined_call_operand.vmem [shape: s32[16], index: 0, kind: input, shape index: {}]   ;;  %s156_s1 = inlined_call_operand.vmem [shape: f32[16,128], index: 1, kind: input, shape index: {}]   ;;  %s157_s2 = inlined_call_operand.vmem [shape: f32[1,128], index: 2, kind: input, shape index: {}]   ;;  %s158_s3 = inlined_call_operand.vmem [shape: f32[1,128], index: 3, kind: input, shape index: {}]   ;;  %s159_s4 = inlined_call_operand.vmem [shape: f32[8,128], index: 4, kind: output, shape index: {}]  }
   0x1   :  { %s10_s17 = sshll.u32 %s155_s0, 4  ;;  %s11_s17 = int_to_ptr.vmem [resolvable:$true] %s10_s17 }
   0x2   :  { %13 = dma.vmem_to_smem %s11_s17, 16, %s104_s18, [#allocation2] }
   0x3   :  { %98 = dma.done.wait [#allocation2], 16 }
   0x4   :  { %99 = vsyncadd [#allocation2], 4294967280 }
   0x5   :  { %16 = sfence }
   0x6   :  { %v105_v0 = vmov 0.0   ;;  %s100_s21 = smov 0  }
   0x7   :  { %27 = vst [vmem:[%s159_s4] sm:$0xff] %v105_v0 }
   0x8 LB: > { %s36_s22 = sld [smem:[#allocation3 + %s102_s21]]  ;;  %s39_s0 = scalar_lea.vmem %s156_s1, %s102_s21  ;;  %s102_s21 = sphi %s100_s21, %s34_s21  }
   0x9   : > { %v40_v1 = vld [vmem:[%s39_s0] sm:$0x1]  ;;  %s34_s21 = sadd.s32 1, %s102_s21  }
   0xa   : > { %p31_p0 = scmp.ge.s32.totalorder %s34_s21, 16  }
   0xb   :  { %v80_v5 = vld [vmem:[%s157_s2] ss:$0 sm:$0xff] (%p31_p0) }
   0xc   :  { %v81_v6 = vld [vmem:[%s158_s3] ss:$0 sm:$0xff] (%p31_p0) }
   0xe   : > { %s37_s27 = scalar_lea.vmem %s159_s4, %s36_s22  ;;  %33 = sbr.rel (!%p31_p0) target bundleno = 8 (0x8), region = 49 }
   0xf   : > { %v38_v2 = vld [vmem:[%s37_s27] sm:$0x1] }
  0x10   : > { %v41_v3 = vadd.f32 %v40_v1, %v38_v2 }
  0x12   : > { %42 = vst [vmem:[%s37_s27] sm:$0x1] %v41_v3 }
  0x19   :  { %v46_v4 = vld [vmem:[%s159_s4] sm:$0xff] }
  0x1a   :  { %v51_v7 = vmul.f32 %v80_v5, %v46_v4 }
  0x1c   :  { %v56_v8 = vadd.f32 %v81_v6, %v51_v7 }
  0x1e   :  { %v57_v9 = vmax.f32 %v56_v8, 0.0 }
  0x20   :  { %58 = vst [vmem:[%s159_s4] sm:$0xff] %v57_v9 }

// kernel: gnn_pred_e_forward.27
= control target key start
LH: loop header
LB: loop body
LE: loop exit
PB: predicated region body
PF: predicated region fallthrough
CT: control target
= control target key end

     0   :  { %s225_s1 = inlined_call_operand.vmem [shape: bf16[128,128], index: 1, kind: input, shape index: {}]   ;;  %s226_s2 = inlined_call_operand.vmem [shape: f32[1,128], index: 2, kind: input, shape index: {}]   ;;  %s227_s3 = inlined_call_operand.vmem [shape: f32[1,128], index: 3, kind: input, shape index: {}]   ;;  %s228_s0 = inlined_call_operand.vmem [shape: bf16[8,128], index: 0, kind: input, shape index: {}]   ;;  %s229_s4 = inlined_call_operand.vmem [shape: f32[8,128], index: 4, kind: output, shape index: {}]  }
   0x1   :  { %v161_v0 = vld [vmem:[%s225_s1 + $0x38] sm:$0xff]  ;;  %v160_v1 = vld [vmem:[%s225_s1 + $0x30] sm:$0xff]  ;;  %v159_v2 = vld [vmem:[%s225_s1 + $0x28] sm:$0xff] }
   0x2   :  { %88 = vmatpush.bf16.msra.mxu0 %v161_v0  ;;  %v158_v3 = vld [vmem:[%s225_s1 + $0x20] sm:$0xff]  ;;  %v157_v4 = vld [vmem:[%s225_s1 + $0x18] sm:$0xff]  ;;  %v156_v5 = vld [vmem:[%s225_s1 + $0x10] sm:$0xff] }
   0x3   :  { %v155_v6 = vld [vmem:[%s225_s1 + $0x8] sm:$0xff]  ;;  %v154_v7 = vld [vmem:[%s225_s1] sm:$0xff] }
   0x4   :  { %v23_v8 = vld [vmem:[%s228_s0] sm:$0xf] }
   0x5   :  { %v162_v9 = vld [vmem:[%s226_s2] ss:$0 sm:$0xff] }
   0x6   :  { %89 = vmatpush.bf16.msra.mxu0 %v160_v1  ;;  %v163_v10 = vld [vmem:[%s227_s3] ss:$0 sm:$0xff] }
   0xa   :  { %90 = vmatpush.bf16.msra.mxu0 %v159_v2 }
   0xe   :  { %91 = vmatpush.bf16.msra.mxu0 %v158_v3 }
  0x12   :  { %92 = vmatpush.bf16.msra.mxu0 %v157_v4 }
  0x16   :  { %93 = vmatpush.bf16.msra.mxu0 %v156_v5 }
  0x1a   :  { %94 = vmatpush.bf16.msra.mxu0 %v155_v6 }
  0x1e   :  { %95 = vmatpush.bf16.msra.mxu0 %v154_v7 }
  0x21   :  { %96 = vmatmul.bf16.vlgmr.msra.gmra.mxu0 %v23_v8 }
  0x9e   :  { %v97_v11 = vpop.f32.mrf.mxu0 }
  0x9f   :  { %v111_v12 = vmul.f32 %v162_v9, %v97_v11 }
  0xa1   :  { %v116_v13 = vadd.f32 %v163_v10, %v111_v12 }
  0xa3   :  { %117 = vst [vmem:[%s229_s4] sm:$0xff] %v116_v13 }
  0xa6   :  { %v99_v14 = vpop.f32.mrf.mxu0 }

</bundles_post_ra>
